<compile_context>
chip_gen: v7x
topology: tpu7x:2x2x1
jax: 0.10.0
libtpu: 0.0.40
codegen_flags: <defaults>
</compile_context>

<pallas_src>
import math
import functools

import jax
import jax.numpy as jnp
from jax.experimental import pallas as pl
from jax.experimental.pallas import tpu as pltpu


def _round_up(x, m):
    return ((x + m - 1) // m) * m


def _gelu_ln_epilogue(y, p_ref, o_ref, *, d_out, eps, masked, approx_gelu):
    """y: (TM, D_pad) f32 linear output (bias NOT yet added).

    p_ref rows: 0=bias, 1=ln_gamma, 2=ln_beta, 3=valid-column mask (f32 0/1).
    Padded columns of y are exactly zero (zero weight cols, zero bias,
    gelu(0)=0), so row sums over D_pad equal sums over the real D_out
    columns; only the (y - mu) term needs masking for the variance.
    """
    bias = p_ref[0:1, :]
    gamma = p_ref[1:2, :]
    beta = p_ref[2:3, :]

    y = y + bias
    if approx_gelu:
        # tanh-approximate GELU: tanh runs on the EUP slot instead of a long
        # VALU erf polynomial.  Opt-in (deviates from torch.nn.GELU default).
        c = math.sqrt(2.0 / math.pi)
        y = 0.5 * y * (1.0 + jnp.tanh(c * (y + 0.044715 * (y * y * y))))
    else:
        # Exact erf GELU (matches torch.nn.GELU default numerics).
        y = 0.5 * y * (1.0 + jax.lax.erf(y * (1.0 / math.sqrt(2.0))))

    inv_d = 1.0 / d_out
    mu = jnp.sum(y, axis=-1, keepdims=True) * inv_d
    diff = y - mu
    if masked:
        diff = diff * p_ref[3:4, :]          # zero out padded columns (1 mul)
    var = jnp.sum(diff * diff, axis=-1, keepdims=True) * inv_d
    y_norm = diff * jax.lax.rsqrt(var + eps)
    o_ref[...] = (y_norm * gamma + beta).astype(o_ref.dtype)


def _adapter_kernel(x_ref, w_ref, p_ref, o_ref, *, d_out, eps, masked,
                    approx_gelu):
    # Resident-weight path: whole (D_in, D_pad) weight lives in VMEM.
    y = jnp.dot(x_ref[...], w_ref[...], preferred_element_type=jnp.float32)
    _gelu_ln_epilogue(y, p_ref, o_ref, d_out=d_out, eps=eps, masked=masked,
                      approx_gelu=approx_gelu)


def _adapter_kernel_ktiled(x_ref, w_ref, p_ref, o_ref, acc_ref, *, d_out, eps,
                           masked, approx_gelu):
    # K-tiled path: weight streamed in (tk, D_pad) slices; f32 accumulator.
    k = pl.program_id(1)

    @pl.when(k == 0)
    def _():
        acc_ref[...] = jnp.zeros_like(acc_ref)

    acc_ref[...] += jnp.dot(x_ref[...], w_ref[...],
                            preferred_element_type=jnp.float32)

    @pl.when(k == pl.num_programs(1) - 1)
    def _():
        _gelu_ln_epilogue(acc_ref[...], p_ref, o_ref, d_out=d_out, eps=eps,
                          masked=masked, approx_gelu=approx_gelu)


def image_to_text_adapter(image_embeddings, w, b, gamma, beta, *, eps=1e-5,
                          tm=512, approx_gelu=False,
                          vmem_budget_bytes=44 * 1024 * 1024,
                          force_k_tiling=False):
    """image_embeddings: (B, S, D_in) -> (B, S, D_out).

    `w` is stored as (D_in, D_out) (pre-transposed vs torch Linear.weight),
    so the kernel computes x @ w + b, matching x @ weight.T + bias.

    vmem_budget_bytes: per-core tile budget.  Default (44 MiB) is v7x-safe
    (64 MiB physical per TC); on v5e/v6e (128 MiB VMEM) it may be raised to
    ~96 MiB to keep larger production weights resident.
    """
    B, S, D_in = image_embeddings.shape
    D_out = w.shape[1]
    N = B * S

    x_it = jnp.dtype(image_embeddings.dtype).itemsize
    w_it = jnp.dtype(w.dtype).itemsize

    # Lane-dense output: pad the feature/output dim to a multiple of 128.
    D_pad = _round_up(D_out, 128)
    masked = D_pad != D_out

    # ---------------- VMEM accounting ----------------
    # f32 epilogue intermediates (linear result / diff / y_norm) live as full
    # (tm, D_pad) f32 tiles at peak.
    epi_row = 3 * D_pad * 4
    # Resident path: x + out tiles double-buffered; weight and params slab
    # single-buffered (pipeline_mode=pl.Buffered(1)).
    fixed_res = D_in * D_pad * w_it + 4 * D_pad * 4
    per_row_res = 2 * D_in * x_it + 2 * D_pad * x_it + epi_row
    if vmem_budget_bytes > fixed_res:
        tm_vmem_cap = ((vmem_budget_bytes - fixed_res) // per_row_res) // 8 * 8
    else:
        tm_vmem_cap = 0

    n_rows8 = _round_up(max(N, 1), 8)
    # Keep >= 2 row tiles so the "parallel" axis can feed both v7x TCs.
    multicore_cap = _round_up(-(-N // 2), 8) if N > 8 else n_rows8

    use_k_tiling = force_k_tiling or tm_vmem_cap < min(64, n_rows8)

    def _choose_tm(cap_rows):
        cap = int(max(8, min(_round_up(tm, 8), cap_rows, multicore_cap,
                             n_rows8)))
        # Prefer a divisor of N so no row padding / row slicing is needed
        # (avoids a full extra HBM pass over the activations).
        if N % 8 == 0:
            for d in range(cap, 7, -8):
                if N % d == 0:
                    return d
        return cap

    if not use_k_tiling:
        tm_sel = _choose_tm(tm_vmem_cap)
        tk = D_in
        K_pad = D_in
        n_k = 1
        kernel = functools.partial(_adapter_kernel, d_out=D_out, eps=eps,
                                   masked=masked, approx_gelu=approx_gelu)
        in_specs = [
            pl.BlockSpec((tm_sel, D_in), lambda i: (i, 0)),      # x row tile
            pl.BlockSpec((D_in, D_pad), lambda i: (0, 0),        # resident W
                         pipeline_mode=pl.Buffered(1)),
            pl.BlockSpec((4, D_pad), lambda i: (0, 0),           # params slab
                         pipeline_mode=pl.Buffered(1)),
        ]
        out_specs = pl.BlockSpec((tm_sel, D_pad), lambda i: (i, 0))
        scratch = []
        dims = ("parallel",)
    else:
        # K-tiled fallback: keep tm large and stream the weight in K slices.
        best = None
        for tm_try in (256, 128, 64, 32, 16, 8):
            tm_try = max(8, min(tm_try, multicore_cap, n_rows8))
            fixed_k = (4 * D_pad * 4                 # params slab (1x)
                       + tm_try * D_pad * 4          # f32 accumulator scratch
                       + 2 * tm_try * D_pad * 4      # epilogue f32 temps
                       + 2 * tm_try * D_pad * x_it)  # out tile (2x)
            denom = 2 * tm_try * x_it + 2 * D_pad * w_it  # per K column (2x)
            if vmem_budget_bytes > fixed_k:
                tk_cap = ((vmem_budget_bytes - fixed_k) // denom) // 128 * 128
            else:
                tk_cap = 0
            if tk_cap >= 128:
                best = (tm_try, int(min(tk_cap, _round_up(D_in, 128))))
                break
        if best is None:
            best = (8, 128)  # minimum viable tiles; vmem_limit gives headroom
        tm_sel, tk = best
        tm_sel = _choose_tm(tm_sel)
        n_k = -(-D_in // tk)
        K_pad = n_k * tk
        kernel = functools.partial(_adapter_kernel_ktiled, d_out=D_out,
                                   eps=eps, masked=masked,
                                   approx_gelu=approx_gelu)
        in_specs = [
            pl.BlockSpec((tm_sel, tk), lambda i, k: (i, k)),      # x tile
            pl.BlockSpec((tk, D_pad), lambda i, k: (k, 0)),       # W K-slice
            pl.BlockSpec((4, D_pad), lambda i, k: (0, 0),         # params slab
                         pipeline_mode=pl.Buffered(1)),
        ]
        out_specs = pl.BlockSpec((tm_sel, D_pad), lambda i, k: (i, 0))
        scratch = [pltpu.VMEM((tm_sel, D_pad), jnp.float32)]
        dims = ("parallel", "arbitrary")

    n_tiles = -(-N // tm_sel)
    N_pad = n_tiles * tm_sel
    pad_rows = N_pad - N
    pad_k = K_pad - D_in

    # Zero padding keeps the matmul and LayerNorm stats of real columns exact.
    x2d = image_embeddings.reshape(N, D_in)
    if pad_rows or pad_k:
        x2d = jnp.pad(x2d, ((0, pad_rows), (0, pad_k)))
    w_p = w
    if D_pad != D_out or pad_k:
        w_p = jnp.pad(w, ((0, pad_k), (0, D_pad - D_out)))

    params = jnp.zeros((4, D_pad), jnp.float32)
    params = params.at[0, :D_out].set(b.astype(jnp.float32))
    params = params.at[1, :D_out].set(gamma.astype(jnp.float32))
    params = params.at[2, :D_out].set(beta.astype(jnp.float32))
    params = params.at[3, :D_out].set(1.0)   # valid-column mask

    # Scoped-VMEM limit: explicit so the Python budget actually holds on
    # every chip (v5e default is only 16 MiB).  Stays under v7x's 64 MiB.
    vmem_limit = int(max(vmem_budget_bytes + 16 * 1024 * 1024,
                         32 * 1024 * 1024))

    w_reads = n_tiles if use_k_tiling else 1
    cost = pl.CostEstimate(
        flops=2 * N_pad * K_pad * D_pad + 10 * N_pad * D_pad,
        transcendentals=N_pad * D_pad,
        bytes_accessed=(N_pad * K_pad * x_it
                        + w_reads * K_pad * D_pad * w_it
                        + 4 * D_pad * 4
                        + N_pad * D_pad * x_it),
    )

    grid = (n_tiles,) if not use_k_tiling else (n_tiles, n_k)

    out2d = pl.pallas_call(
        kernel,
        out_shape=jax.ShapeDtypeStruct((N_pad, D_pad), image_embeddings.dtype),
        grid_spec=pltpu.PrefetchScalarGridSpec(
            num_scalar_prefetch=0,
            grid=grid,
            in_specs=in_specs,
            out_specs=out_specs,
            scratch_shapes=scratch,
        ),
        compiler_params=pltpu.CompilerParams(
            dimension_semantics=dims,
            vmem_limit_bytes=vmem_limit,
        ),
        cost_estimate=cost,
    )(x2d, w_p, params)

    if N_pad != N or D_pad != D_out:
        out2d = out2d[:N, :D_out]
    return out2d.reshape(B, S, D_out)


if __name__ == "__main__":
    # Small shapes consistent with the module's forward: (B, S, image_embed_dim)
    B, S = 2, 8
    image_embed_dim = 32
    text_embed_dim = 32

    key = jax.random.PRNGKey(0)
    k_x, k_w, k_b, k_g, k_be = jax.random.split(key, 5)

    x = jax.random.normal(k_x, (B, S, image_embed_dim), dtype=jnp.float32)
    w = jax.random.normal(k_w, (image_embed_dim, text_embed_dim),
                          dtype=jnp.float32) * (1.0 / math.sqrt(image_embed_dim))
    b = jax.random.normal(k_b, (text_embed_dim,), dtype=jnp.float32) * 0.02
    gamma = 1.0 + 0.1 * jax.random.normal(k_g, (text_embed_dim,), jnp.float32)
    beta = 0.05 * jax.random.normal(k_be, (text_embed_dim,), jnp.float32)

    def ref_adapter(x_in, approx):
        y = x_in @ w + b
        if approx:
            c = math.sqrt(2.0 / math.pi)
            y = 0.5 * y * (1.0 + jnp.tanh(c * (y + 0.044715 * y ** 3)))
        else:
            y = 0.5 * y * (1.0 + jax.lax.erf(y / math.sqrt(2.0)))
        mu = jnp.mean(y, axis=-1, keepdims=True)
        var = jnp.mean((y - mu) ** 2, axis=-1, keepdims=True)
        return (y - mu) * jax.lax.rsqrt(var + 1e-5) * gamma + beta

    ref_exact = ref_adapter(x, False)
    ref_tanh = ref_adapter(x, True)

    # 1) Default resident-weight path (exact erf GELU, torch-matching).
    out = jax.block_until_ready(image_to_text_adapter(x, w, b, gamma, beta))
    assert out.shape == (B, S, text_embed_dim)
    assert jnp.allclose(out, ref_exact, atol=2e-5, rtol=2e-5), \
        float(jnp.max(jnp.abs(out - ref_exact)))

    # 2) K-tiled accumulator fallback (production-weight path), forced here.
    out_k = jax.block_until_ready(
        image_to_text_adapter(x, w, b, gamma, beta, force_k_tiling=True))
    assert jnp.allclose(out_k, ref_exact, atol=2e-5, rtol=2e-5), \
        float(jnp.max(jnp.abs(out_k - ref_exact)))

    # 3) Opt-in tanh-approximate GELU (EUP path).
    out_a = jax.block_until_ready(
        image_to_text_adapter(x, w, b, gamma, beta, approx_gelu=True))
    assert jnp.allclose(out_a, ref_tanh, atol=1e-4, rtol=1e-4), \
        float(jnp.max(jnp.abs(out_a - ref_tanh)))

    print("KERNEL_OK")
</pallas_src>

<mosaic_0001>
module attributes {stable_mosaic.version = 11 : i64} {
  func.func @_adapter_kernel(%arg0: i32, %arg1: memref<8x32xf32, #tpu.memory_space<vmem>>, %arg2: memref<32x128xf32, #tpu.memory_space<vmem>>, %arg3: memref<4x128xf32, #tpu.memory_space<vmem>>, %arg4: memref<8x128xf32, #tpu.memory_space<vmem>>) attributes {dimension_semantics = [#tpu.dimension_semantics<parallel>], iteration_bounds = array<i64: 2>, scalar_prefetch = 0 : i64, scratch_operands = 0 : i64, tpu.core_type = #tpu.core_type<tc>, window_params = [{transform_indices = @transform_0, window_bounds = array<i64: 8, 32>}, {pipeline_mode = #tpu.pipeline_mode<synchronous>, transform_indices = @transform_1, window_bounds = array<i64: 32, 128>}, {pipeline_mode = #tpu.pipeline_mode<synchronous>, transform_indices = @transform_2, window_bounds = array<i64: 4, 128>}, {transform_indices = @transform_3, window_bounds = array<i64: 8, 128>}]} {
    %c0 = arith.constant 0 : index
    %c0_0 = arith.constant 0 : index
    %0 = vector.load %arg1[%c0, %c0_0] : memref<8x32xf32, #tpu.memory_space<vmem>>, vector<8x32xf32>
    %c0_1 = arith.constant 0 : index
    %c0_2 = arith.constant 0 : index
    %1 = vector.load %arg2[%c0_1, %c0_2] : memref<32x128xf32, #tpu.memory_space<vmem>>, vector<32x128xf32>
    %cst = arith.constant dense<0.000000e+00> : vector<8x128xf32>
    %2 = tpu.matmul %0, %1, %cst {dimension_numbers = #tpu.dot_dimension_numbers<[1], [0], [0], [1], [0, 0, 1, 1], [], []>} : vector<8x32xf32>, vector<32x128xf32>, vector<8x128xf32> -> vector<8x128xf32>
    %c0_3 = arith.constant 0 : index
    %c0_4 = arith.constant 0 : index
    %3 = vector.load %arg3[%c0_3, %c0_4] : memref<4x128xf32, #tpu.memory_space<vmem>>, vector<1x128xf32>
    %c1 = arith.constant 1 : index
    %c0_5 = arith.constant 0 : index
    %4 = vector.load %arg3[%c1, %c0_5] : memref<4x128xf32, #tpu.memory_space<vmem>>, vector<1x128xf32>
    %c2 = arith.constant 2 : index
    %c0_6 = arith.constant 0 : index
    %5 = vector.load %arg3[%c2, %c0_6] : memref<4x128xf32, #tpu.memory_space<vmem>>, vector<1x128xf32>
    %6 = vector.broadcast %3 : vector<1x128xf32> to vector<8x128xf32>
    %7 = arith.addf %2, %6 : vector<8x128xf32>
    %cst_7 = arith.constant 5.000000e-01 : f32
    %8 = vector.broadcast %cst_7 : f32 to vector<8x128xf32>
    %9 = arith.mulf %8, %7 : vector<8x128xf32>
    %cst_8 = arith.constant 0.707106769 : f32
    %10 = vector.broadcast %cst_8 : f32 to vector<8x128xf32>
    %11 = arith.mulf %7, %10 : vector<8x128xf32>
    %12 = math.erf %11 : vector<8x128xf32>
    %cst_9 = arith.constant 1.000000e+00 : f32
    %13 = vector.broadcast %cst_9 : f32 to vector<8x128xf32>
    %14 = arith.addf %13, %12 : vector<8x128xf32>
    %15 = arith.mulf %9, %14 : vector<8x128xf32>
    %cst_10 = arith.constant dense<0.000000e+00> : vector<8xf32>
    %16 = vector.multi_reduction <add>, %15, %cst_10 [1] : vector<8x128xf32> to vector<8xf32>
    %17 = vector.shape_cast %16 : vector<8xf32> to vector<8x1xf32>
    %cst_11 = arith.constant 3.125000e-02 : f32
    %18 = vector.broadcast %cst_11 : f32 to vector<8x1xf32>
    %19 = arith.mulf %17, %18 : vector<8x1xf32>
    %20 = vector.broadcast %19 : vector<8x1xf32> to vector<8x128xf32>
    %21 = arith.subf %15, %20 : vector<8x128xf32>
    %c3 = arith.constant 3 : index
    %c0_12 = arith.constant 0 : index
    %22 = vector.load %arg3[%c3, %c0_12] : memref<4x128xf32, #tpu.memory_space<vmem>>, vector<1x128xf32>
    %23 = vector.broadcast %22 : vector<1x128xf32> to vector<8x128xf32>
    %24 = arith.mulf %21, %23 : vector<8x128xf32>
    %25 = arith.mulf %24, %24 : vector<8x128xf32>
    %cst_13 = arith.constant dense<0.000000e+00> : vector<8xf32>
    %26 = vector.multi_reduction <add>, %25, %cst_13 [1] : vector<8x128xf32> to vector<8xf32>
    %27 = vector.shape_cast %26 : vector<8xf32> to vector<8x1xf32>
    %cst_14 = arith.constant 3.125000e-02 : f32
    %28 = vector.broadcast %cst_14 : f32 to vector<8x1xf32>
    %29 = arith.mulf %27, %28 : vector<8x1xf32>
    %cst_15 = arith.constant 9.99999974E-6 : f32
    %30 = vector.broadcast %cst_15 : f32 to vector<8x1xf32>
    %31 = arith.addf %29, %30 : vector<8x1xf32>
    %32 = math.rsqrt %31 : vector<8x1xf32>
    %33 = vector.broadcast %32 : vector<8x1xf32> to vector<8x128xf32>
    %34 = arith.mulf %24, %33 : vector<8x128xf32>
    %35 = vector.broadcast %4 : vector<1x128xf32> to vector<8x128xf32>
    %36 = arith.mulf %34, %35 : vector<8x128xf32>
    %37 = vector.broadcast %5 : vector<1x128xf32> to vector<8x128xf32>
    %38 = arith.addf %36, %37 : vector<8x128xf32>
    %c0_16 = arith.constant 0 : index
    %c0_17 = arith.constant 0 : index
    %39 = vector.load %arg4[%c0_16, %c0_17] : memref<8x128xf32, #tpu.memory_space<vmem>>, vector<8x128xf32>
    tpu.vector_store %arg4[%c0_16, %c0_17], %38 {strides = array<i32>} : memref<8x128xf32, #tpu.memory_space<vmem>>, vector<8x128xf32>,
    return
  }
  func.func @transform_0(%arg0: i32) -> (i32, i32) {
    %c0_i32 = arith.constant 0 : i32
    %c0_i32_0 = arith.constant 0 : i32
    return %arg0, %c0_i32 : i32, i32
  }
  func.func @transform_1(%arg0: i32) -> (i32, i32) {
    %c0_i32 = arith.constant 0 : i32
    %c0_i32_0 = arith.constant 0 : i32
    %c0_i32_1 = arith.constant 0 : i32
    return %c0_i32, %c0_i32_0 : i32, i32
  }
  func.func @transform_2(%arg0: i32) -> (i32, i32) {
    %c0_i32 = arith.constant 0 : i32
    %c0_i32_0 = arith.constant 0 : i32
    %c0_i32_1 = arith.constant 0 : i32
    return %c0_i32, %c0_i32_0 : i32, i32
  }
  func.func @transform_3(%arg0: i32) -> (i32, i32) {
    %c0_i32 = arith.constant 0 : i32
    %c0_i32_0 = arith.constant 0 : i32
    return %arg0, %c0_i32 : i32, i32
  }
}

</mosaic_0001>

<bundles_post_ra>
// kernel: tpu_custom_call.1
= control target key start
LH: loop header
LB: loop body
LE: loop exit
PB: predicated region body
PF: predicated region fallthrough
CT: control target
= control target key end

     0   :  { %8 = vsyncpa [#allocation3], 0  ;;  %s891_s0 = inlined_call_operand.hbm [shape: f32[16,32], index: 0, kind: input, shape index: {}]   ;;  %s892_s1 = inlined_call_operand.hbm [shape: f32[32,128], index: 1, kind: input, shape index: {}]   ;;  %s893_s2 = inlined_call_operand.vmem [shape: f32[4,128], index: 2, kind: input, shape index: {}]   ;;  %s894_s3 = inlined_call_operand.hbm [shape: f32[16,128], index: 3, kind: output, shape index: {}]  }
   0x1   :  { %10 = vsyncpa [#allocation3 + $0x1], 0 }
   0x2   :  { %11 = vsyncpa [#allocation6], 0 }
   0x3   :  { %12 = vsyncpa [#allocation4], 0 }
   0x4   :  { %14 = vsyncpa [#allocation4 + $0x1], 0  ;;  %s679_s12 = smov 0   ;;  %s681_s13 = smov 0  }
   0x5   :  { %s683_s14 = smov 0   ;;  %s685_s15 = smov 0  }
   0x6 LB: > { %s700_s16 = sadd.s32 4294967295, %s649_s15   ;;  %s414_s17 = sadd.s32 4294967294, %s649_s15   ;;  %s649_s15 = sphi %s685_s15, %s914_s15   ;;  %s645_s14 = sphi %s683_s14, %s913_s14   ;;  %s641_s13 = sphi %s681_s13, %s912_s13   ;;  %s637_s12 = sphi %s679_s12, %s911_s12  }
   0x7   : > { %p40_p0 = scmp.ne.s32.totalorder %s641_s13, %s637_s12  ;;  %p895_p1 = scmp.eq.s32.totalorder %s700_s16, 0 }
   0x8   : > { %p112_p3 = scmp.eq.s32.totalorder %s414_s17, 1  ;;  %p415_p5 = scmp.ge.s32.totalorder %s649_s15, 1 }
   0x9   : > { %p709_p4 = por %p895_p1, %p40_p0  ;;  %p119_p7 = scmp.lt.s32.totalorder %s649_s15, 3 }
   0xa   : > { %p714_p6 = por %p112_p3, %p40_p0  ;;  %s651_s21 = smov [#allocation5]  }
   0xb   : > { %s898_s18 = scalar_select %p709_p4, 1, 0 }
   0xc   : > { %s899_s19 = scalar_select %p714_p6, 1, 0 }
   0xd   : > { %p719_p8 = pnand %p415_p5, %p119_p7  ;;  %s131_s22 = sshll.u32 %s651_s21, 4  ;;  %s723_s22 = int_to_ptr.vmem [resolvable:$true] %s131_s22 }
   0xe   : > { %s735_s24 = sadd.s32 1, %s649_s15   ;;  %s27_s25 = sadd.s32 1, %s645_s14 }
   0xf   : > { %s900_s20 = scalar_select %p719_p8, 1, 0 }
  0x10   : > { %p463_p9 = pneg %p719_p8  ;;  %s24_s26 = ssub.s32 %s649_s15, %s735_s24 }
  0x11   : > { %s521_s29 = scalar_lea.hbm %s892_s1, 512 }
  0x12   : > { %p730_p11 = pnand %p463_p9, %p895_p1  ;;  %p522_p12 = scmp.ne.s32.totalorder %s892_s1, %s521_s29 }
  0x13   : > { %p528_p5 = scmp.lt.u32.totalorder %s521_s29, %s892_s1 }
  0x14   : > { %p523_p13 = pneg %p730_p11 }
  0x16   : > { %p524_p0 = pnand %p523_p13, %p522_p12 }
  0x18   : > { %p525_p3 = pneg %p524_p0 }
  0x1a   : > { %p530_p7 = pnand %p528_p5, %p525_p3 }
  0x1c   : > { %533 = shalt.err (!%p530_p7)
}
  0x1d   : > { %s534_s7 = scalar_lea.vmem %s723_s22, 512  ;;  %p542_p2 = scmp.lt.s32.totalorder %s723_s22, %s723_s22 }
  0x1e   : > { %p535_p9 = scmp.ne.s32.totalorder %s723_s22, %s534_s7  ;;  %p543_p6 = scmp.lt.s32.totalorder %s534_s7, %s534_s7 }
  0x20   : > { %p537_p10 = pnand %p535_p9, %p523_p13  ;;  %p544_p4 = por %p543_p6, %p542_p2 }
  0x22   : > { %p538_p1 = pneg %p537_p10 }
  0x24   : > { %p545_p8 = pnand %p544_p4, %p538_p1 }
  0x26   : > { %548 = shalt.err (!%p545_p8)
}
  0x27   : > { %s652_s8 = smov 128   ;;  %s653_s9 = smov 8  }
  0x28   : > { %466 = dma.hbm_to_vmem [thread:$0]  (!%p730_p11), %s892_s1, 512, %s723_s22, [#allocation6], %s652_s8, %s652_s8, %s653_s9  }
  0x29   : > { %p25_p2 = scmp.eq.s32.totalorder %s24_s26, 0  ;;  %p34_p1 = scmp.ne.s32.totalorder %s645_s14, %s641_s13 }
  0x2a   : > { %p35_p4 = scmp.eq.s32.totalorder %s649_s15, 0  ;;  %p476_p6 = scmp.lt.s32.totalorder %s649_s15, 2 }
  0x2b   : > { %s766_s17 = scalar_select %p25_p2, %s645_s14, %s27_s25  }
  0x2c   : > { %p36_p8 = por %p35_p4, %p34_p1  ;;  %p902_p10 = scmp.eq.s32.totalorder %s700_s16, 1 }
  0x2d   : > { %s148_s27 = sand.u32 1, %s645_s14   ;;  %s419_s28 = sshll.u32 %s649_s15, 7 }
  0x2e   : > { %p770_p12 = por %p902_p10, %p34_p1  ;;  %s418_s29 = sshll.u32 %s148_s27, 3 }
  0x2f   : > { %s779_s4 = scalar_lea.hbm %s891_s0, %s419_s28  ;;  %s152_s22 = scalar_lea.vmem [#allocation2], %s418_s29 }
  0x30   : > { %s159_s25 = sshll.u32 %s152_s22, 4  ;;  %p781_p11 = pnand %p476_p6, %p36_p8  ;;  %s785_s25 = int_to_ptr.vmem [resolvable:$true] %s159_s25 }
  0x31   : > { %s149_s5 = scalar_lea.sflag [#allocation3], %s148_s27  ;;  %s549_s6 = scalar_lea.hbm %s779_s4, 128 }
  0x32   : > { %p550_p13 = scmp.ne.s32.totalorder %s779_s4, %s549_s6  ;;  %p551_p0 = pneg %p781_p11 }
  0x33   : > { %s554_s9 = scalar_lea.hbm %s891_s0, 256  ;;  %p555_p7 = scmp.lt.u32.totalorder %s779_s4, %s891_s0 }
  0x34   : > { %p552_p3 = pnand %p551_p0, %p550_p13  ;;  %p556_p9 = scmp.lt.u32.totalorder %s554_s9, %s549_s6 }
  0x35   : > { %p558_p1 = scmp.lt.u32.totalorder %s549_s6, %s779_s4 }
  0x36   : > { %p553_p5 = pneg %p552_p3  ;;  %p557_p2 = por %p556_p9, %p555_p7 }
  0x38   : > { %p559_p4 = por %p558_p1, %p557_p2 }
  0x3a   : > { %p560_p6 = pnand %p559_p4, %p553_p5 }
  0x3c   : > { %563 = shalt.err (!%p560_p6)
}
  0x3d   : > { %s564_s27 = scalar_lea.vmem %s785_s25, 128  ;;  %s654_s28 = smov [#allocation2]  }
  0x3e   : > { %p565_p8 = scmp.ne.s32.totalorder %s785_s25, %s564_s27  ;;  %s569_s29 = sshll.u32 %s654_s28, 4  ;;  %s570_s29 = int_to_ptr.vmem [resolvable:$false] %s569_s29 }
  0x3f   : > { %s571_s23 = scalar_lea.vmem %s570_s29, 256  ;;  %p572_p3 = scmp.lt.s32.totalorder %s785_s25, %s570_s29 }
  0x40   : > { %p567_p10 = pnand %p565_p8, %p551_p0  ;;  %p573_p7 = scmp.lt.s32.totalorder %s571_s23, %s564_s27 }
  0x42   : > { %p568_p13 = pneg %p567_p10  ;;  %p574_p9 = por %p573_p7, %p572_p3 }
  0x44   : > { %p575_p2 = pnand %p574_p9, %p568_p13 }
  0x46   : > { %578 = shalt.err (!%p575_p2)
}
  0x47   : > { %470 = dma.hbm_to_vmem [thread:$0]  (!%p781_p11), %s779_s4, 128, %s785_s25, %s149_s5  }
  0x48   : > { %p905_p5 = scmp.ne.s32.totalorder %s900_s20, 0 }
  0x49   : > { %s815_s30 = sand.u32 (!%p905_p5), 1, %s641_s13   ;;  %p906_p0 = scmp.ne.s32.totalorder (!%p905_p5), %s898_s18, 0 }
  0x4a   : > { %168 = sbr.rel (%p905_p5) target bundleno = 653 (0x28d), region = 32  ;;  %s421_s22 = sshll.u32 (!%p905_p5), %s815_s30, 3 }
  0x4b   : > { %s171_s6 = scalar_lea.sflag (!%p905_p5), [#allocation3], %s815_s30  ;;  %s174_s7 = scalar_lea.vmem (!%p905_p5), [#allocation2], %s421_s22 }
  0x51   : > { %624 = dma.done.wait (%p906_p0), %s171_s6, 128  }
  0x52   : > { %626 = vsyncadd (%p906_p0), %s171_s6, 4294967168  ;;  %p907_p11 = scmp.eq.s32.totalorder %s700_s16, 0 }
  0x54   : > { %628 = dma.done.wait (%p907_p11), [#allocation6], 512   ;;  %p908_p1 = pmov %p907_p11 }
  0x55   : > { %v655_v0 = vmov 0.0|0.0   ;;  %vm656_vm0 = vmmov 0   ;;  %v657_v1 = vmov 0.0   ;;  %v202_v2 = vld [vmem:[#allocation5] sm:$0xff]  ;;  %v203_v3 = vld [vmem:[#allocation5 + $0x8] sm:$0xff]  ;;  %v204_v4 = vld [vmem:[#allocation5 + $0x10] sm:$0xff] }
  0x56   : > { %630 = vsyncadd (%p908_p1), [#allocation6], 4294966784  ;;  %449 = vmatprep.subr.bf16.mxu0 %v655_v0  ;;  %446 = vmatprep.mubr.msk.f32.mxu0 %vm656_vm0, %v657_v1  ;;  %v450_v5 = vpack.c.bf16 %v203_v3, %v202_v2  ;;  %v205_v6 = vld [vmem:[#allocation5 + $0x18] sm:$0xff]  ;;  %vm213_vm1 = vcmask 261120   ;;  %v424_v9 = vld [vmem:[%s893_s2] ss:$0 sm:$0xff] }
  0x57   : > { %v453_v7 = vpack.c.bf16 %v205_v6, %v204_v4  ;;  %v201_v8 = vld [vmem:[%s174_s7] sm:$0xff]  ;;  %s430_s10 = sshll.u32 %s700_s16, 7  ;;  %s200_s11 = scalar_lea.vmem [#allocation7], %s421_s22 }
  0x58   : > { %451 = vmatpush3.bf16.msra.mxu0 %v450_v5  ;;  %v426_v20 = vld [vmem:[%s893_s2 + $0x3] ss:$0 sm:$0xff]  ;;  %v427_v28 = vld [vmem:[%s893_s2 + $0x1] ss:$0 sm:$0xff]  ;;  %v428_v30 = vld [vmem:[%s893_s2 + $0x2] ss:$0 sm:$0xff]  ;;  %s847_s23 = scalar_lea.hbm %s894_s3, %s430_s10 }
  0x59   : > { %452 = vmatprep.subr.bf16.mxu0 %v655_v0  ;;  %s334_s27 = sshll.u32 %s200_s11, 4  ;;  %s321_s6 = scalar_lea.sflag [#allocation4], %s815_s30  ;;  %s849_s27 = int_to_ptr.vmem [resolvable:$true] %s334_s27 }
  0x5a   : > { %s579_s7 = scalar_lea.vmem %s849_s27, 128  ;;  %s658_s16 = smov [#allocation7]  }
  0x5b   : > { %p580_p4 = scmp.ne.s32.totalorder %s849_s27, %s579_s7  ;;  %s583_s22 = sshll.u32 %s658_s16, 4  ;;  %s584_s22 = int_to_ptr.vmem [resolvable:$false] %s583_s22 }
  0x5c   : > { %454 = vmatpush3.bf16.msra.mxu0 %v453_v7  ;;  %s585_s18 = scalar_lea.vmem %s584_s22, 256  ;;  %p586_p10 = scmp.lt.s32.totalorder %s849_s27, %s584_s22 }
  0x5d   : > { %p581_p6 = pnand %p580_p4, %p770_p12  ;;  %p587_p13 = scmp.lt.s32.totalorder %s585_s18, %s579_s7 }
  0x5f   : > { %447 = vmatmul.mubr.msk.f32.vlgmr.msra.gmra.mrb[0].mxu0 %vm213_vm1, %v201_v8  ;;  %p582_p8 = pneg %p581_p6  ;;  %p588_p3 = por %p587_p13, %p586_p10 }
  0x61   : > { %p589_p7 = pnand %p588_p3, %p582_p8 }
 0x132   : > { %v283_v10 = vpop.f32.mrb[0].mxu0 }
 0x133   : > { %v284_v11 = vadd.f32 %v424_v9, %v283_v10  ;;  %v448_v12 = vpop.f32.mrb[1].mxu0 }
 0x135   : > { %v288_v13 = vmul.f32 0.70710677, %v284_v11  ;;  %v287_v15 = vmul.f32 0.5, %v284_v11 }
 0x137   : > { %517 = verf.f32 %v288_v13 }
 0x141   : > { %v518_v14 = vpop.eup %517 }
 0x142   : > { %v290_v16 = vadd.f32 1.0, %v518_v14 }
 0x144   : > { %v291_v17 = vmul.f32 %v290_v16, %v287_v15 }
 0x146   : > { %292 = vadd.xlane.f32.xlu0 %v291_v17 }
 0x1d3   : > { %v293_v18 = vpop.xlane.xlu0 %292 }
 0x1d4   : > { %v294_v19 = vmul.f32 0.03125, %v293_v18 }
 0x1d6   : > { %v295_v21 = vsub.f32 %v291_v17, %v294_v19 }
 0x1d8   : > { %v301_v22 = vmul.f32 %v426_v20, %v295_v21 }
 0x1da   : > { %v302_v23 = vmul.f32 %v301_v22, %v301_v22 }
 0x1dc   : > { %303 = vadd.xlane.f32.xlu0 %v302_v23 }
 0x269   : > { %v304_v24 = vpop.xlane.xlu0 %303 }
 0x26a   : > { %v305_v25 = vmul.f32 0.03125, %v304_v24 }
 0x26c   : > { %v306_v26 = vadd.f32 1e-05, %v305_v25 }
 0x26e   : > { %519 = vrsqrt.f32 %v306_v26 }
 0x278   : > { %v520_v27 = vpop.eup %519 }
 0x279   : > { %v308_v29 = vmul.f32 %v520_v27, %v301_v22 }
 0x27b   : > { %v313_v31 = vmul.f32 %v427_v28, %v308_v29 }
 0x27d   : > { %v318_v32 = vadd.f32 %v428_v30, %v313_v31 }
 0x27f   : > { %319 = vst [vmem:[%s200_s11] sm:$0xff] %v318_v32 }
 0x280   : > { %592 = shalt.err (!%p589_p7)
}
 0x281   : > { %s593_s30 = scalar_lea.hbm %s847_s23, 128  ;;  %s597_s25 = scalar_lea.hbm %s894_s3, 256 }
 0x282   : > { %p594_p9 = scmp.ne.s32.totalorder %s847_s23, %s593_s30  ;;  %p598_p0 = scmp.lt.u32.totalorder %s847_s23, %s894_s3 }
 0x283   : > { %p599_p11 = scmp.lt.u32.totalorder %s597_s25, %s593_s30  ;;  %p601_p4 = scmp.lt.u32.totalorder %s593_s30, %s847_s23 }
 0x284   : > { %p595_p2 = pnand %p594_p9, %p770_p12 }
 0x285   : > { %p600_p1 = por %p599_p11, %p598_p0 }
 0x286   : > { %p596_p5 = pneg %p595_p2 }
 0x287   : > { %p602_p6 = por %p601_p4, %p600_p1 }
 0x289   : > { %p603_p8 = pnand %p602_p6, %p596_p5 }
 0x28b   : > { %606 = shalt.err (!%p603_p8)
}
 0x28c   : > { %461 = dma.vmem_to_hbm [thread:$0]  (%p770_p12), %s849_s27, 128, %s847_s23, %s321_s6  }
 0x28d PF: > { %s346_s8 = sand.u32 1, %s637_s12   ;;  %p909_p10 = scmp.ne.s32.totalorder %s899_s19, 0 }
 0x28e   : > { %p910_p13 = scmp.ge.s32.totalorder %s649_s15, 2  ;;  %s347_s9 = scalar_lea.sflag [#allocation4], %s346_s8 }
 0x290   : > { %p472_p3 = pnand %p910_p13, %p909_p10 }
 0x292   : > { %632 = dma.done.wait (!%p472_p3), %s347_s9, 128  }
 0x293   : > { %634 = vsyncadd (!%p472_p3), %s347_s9, 4294967168  ;;  %p17_p7 = scmp.ge.s32.totalorder %s735_s24, 4   ;;  %s911_s12 = smov %s641_s13 }
 0x294   : > { %s912_s13 = smov %s645_s14  ;;  %s913_s14 = smov %s766_s17 }
 0x295   : > { %s914_s15 = smov %s735_s24  ;;  %19 = sbr.rel (!%p17_p7) target bundleno = 6 (0x6), region = 81 }
 0x29c   :  { %352 = vsyncpa [#allocation3], 1 }
 0x29d   :  { %354 = vsyncpa [#allocation3 + $0x1], 1 }
 0x29e   :  { %355 = vsyncpa [#allocation6], 1 }
 0x29f   :  { %356 = vsyncpa [#allocation4], 1 }
 0x2a0   :  { %358 = vsyncpa [#allocation4 + $0x1], 1 }

</bundles_post_ra>
